<compile_context>
chip_gen: v6e
topology: v6e:2x2x1
jax: 0.10.0
libtpu: 0.0.40
codegen_flags: <defaults>
</compile_context>

<pallas_src>
import math

import jax
import jax.numpy as jnp
from jax import lax
from jax.experimental import pallas as pl
from jax.experimental.pallas import tpu as pltpu

LANES = 128


def _cdiv(a, b):
    return -(-a // b)


def _bce_elem(x, y):
    # Numerically stable BCE-with-logits (matches torch.nn.BCEWithLogitsLoss):
    #   max(x, 0) - x*y + log1p(exp(-|x|))
    return jnp.maximum(x, 0.0) - x * y + jnp.log1p(jnp.exp(-jnp.abs(x)))


def _make_kernel(tr, chunk, tiles_per_split, tiles_total, guard):
    """Per-tile partial-sum kernel.  Accumulates into a resident (chunk, 128)
    f32 output block; the final cross-lane/sublane reduce happens in the
    wrapper on a tiny array."""
    n_chunks = tr // chunk
    unroll = n_chunks if n_chunks <= 8 else 8

    def kernel(x_ref, y_ref, o_ref):
        c = pl.program_id(0)   # core / split segment       (CORE_PARALLEL on v7x)
        i = pl.program_id(1)   # tile index within segment  ("arbitrary")

        # Zero the resident accumulator at the start of each segment.
        @pl.when(i == 0)
        def _():
            o_ref[...] = jnp.zeros_like(o_ref)

        def compute():
            if n_chunks == 1:
                acc = _bce_elem(x_ref[...].astype(jnp.float32),
                                y_ref[...].astype(jnp.float32))
            else:
                def body(k, acc):
                    r0 = pl.multiple_of(k * chunk, chunk)
                    x = x_ref[pl.ds(r0, chunk), :].astype(jnp.float32)
                    y = y_ref[pl.ds(r0, chunk), :].astype(jnp.float32)
                    return acc + _bce_elem(x, y)

                acc = lax.fori_loop(0, n_chunks, body,
                                    jnp.zeros((chunk, LANES), jnp.float32),
                                    unroll=unroll)
            o_ref[...] += acc

        if guard:
            # The last split may own fewer real tiles than tiles_per_split;
            # skip (but do not mask) the clamped overhang iterations.
            @pl.when(c * tiles_per_split + i < tiles_total)
            def _():
                compute()
        else:
            compute()

    return kernel


def full_loss(logits, labels, inputs=None, graph=None, middle_feats_s=None,
              target=None, loss_weight=None, t_model=None):
    """Pallas equivalent of FullLoss.forward: (mean BCE-with-logits, [0]).

    Only logits/labels participate; the PyTorch module ignores the rest."""
    del inputs, graph, middle_feats_s, target, loss_weight, t_model  # unused by the module

    assert logits.shape == labels.shape
    total = math.prod(logits.shape)

    x_flat = logits.reshape(-1)
    y_flat = labels.reshape(-1)

    itemsize_x = jnp.dtype(logits.dtype).itemsize
    itemsize_y = jnp.dtype(labels.dtype).itemsize
    # Sublane alignment of the row tiling: 8 rows (4-byte), 16 (2-byte), 32 (1-byte).
    sub_align = 8 * max(1, 4 // min(itemsize_x, itemsize_y))

    device_kind = jax.devices()[0].device_kind.lower()
    core_parallel = getattr(pltpu, "CORE_PARALLEL", None)
    is_v7 = "v7" in device_kind
    tr_max = 4096 if is_v7 else 2048   # larger tiles on v7x (3.2 TB/s HBM)

    rows_full = total // LANES                 # complete 128-lane rows
    rem = total - rows_full * LANES            # ragged lane tail, 0..127 elems

    # Tile rows: largest sub_align multiple <= min(tr_max, rows_full).
    tr = (min(tr_max, rows_full) // sub_align) * sub_align

    zero = jnp.array([0], dtype=jnp.int32)

    if tr == 0:
        # Input too small for a single aligned tile: tiny fused XLA path.
        s = jnp.sum(_bce_elem(x_flat.astype(jnp.float32),
                              y_flat.astype(jnp.float32)))
        return s / jnp.float32(total), zero

    tiles_total = rows_full // tr
    kernel_rows = tiles_total * tr
    kernel_elems = kernel_rows * LANES

    # Main 2-D slab in native dtype.  Zero-copy (pure reshape) when the element
    # count is lane aligned; otherwise one prefix materialization is needed to
    # present a (rows, 128) view (no padding, no in-kernel masking ever).
    if rem == 0:
        x2d = x_flat.reshape(rows_full, LANES)
        y2d = y_flat.reshape(rows_full, LANES)
    else:
        x2d = x_flat[:rows_full * LANES].reshape(rows_full, LANES)
        y2d = y_flat[:rows_full * LANES].reshape(rows_full, LANES)

    # Shard the tile stream across TensorCores only where that is real (v7x).
    nsplit = 2 if (is_v7 and core_parallel is not None and tiles_total >= 2) else 1
    tiles_per_split = _cdiv(tiles_total, nsplit)
    guard = nsplit * tiles_per_split != tiles_total

    # Accumulator / chunk rows: wide enough to break the serial add chain,
    # small enough to stay vreg-resident; must divide tr.
    chunk = tr
    for cand in (64, 32, 16, 8):
        if tr % cand == 0:
            chunk = cand
            break

    def in_index_map(c, i):
        t = c * tiles_per_split + i
        if guard:
            t = jnp.minimum(t, tiles_total - 1)   # clamp the skipped overhang tile
        return (t, 0)

    kernel = _make_kernel(tr, chunk, tiles_per_split, tiles_total, guard)

    if nsplit > 1:
        dim_sem = (core_parallel, getattr(pltpu, "ARBITRARY", "arbitrary"))
    else:
        dim_sem = ("arbitrary", "arbitrary")

    partials = pl.pallas_call(
        kernel,
        out_shape=jax.ShapeDtypeStruct((nsplit * chunk, LANES), jnp.float32),
        grid_spec=pltpu.PrefetchScalarGridSpec(
            num_scalar_prefetch=0,
            grid=(nsplit, tiles_per_split),
            in_specs=[
                pl.BlockSpec((tr, LANES), in_index_map),
                pl.BlockSpec((tr, LANES), in_index_map),
            ],
            out_specs=pl.BlockSpec((chunk, LANES), lambda c, i: (c, 0)),
        ),
        compiler_params=pltpu.CompilerParams(dimension_semantics=dim_sem),
        cost_estimate=pl.CostEstimate(
            flops=6 * kernel_elems,
            transcendentals=2 * kernel_elems,
            bytes_accessed=kernel_elems * (itemsize_x + itemsize_y)
            + nsplit * chunk * LANES * 4,
        ),
    )(x2d, y2d)

    main_sum = jnp.sum(partials)   # tiny epilogue reduce

    # Ragged tails (< one row tile, plus < 128 trailing elements) in plain JAX.
    tail_sum = jnp.float32(0.0)
    if kernel_rows < rows_full:
        tail_sum = tail_sum + jnp.sum(
            _bce_elem(x2d[kernel_rows:].astype(jnp.float32),
                      y2d[kernel_rows:].astype(jnp.float32)))
    if rem:
        tail_sum = tail_sum + jnp.sum(
            _bce_elem(x_flat[rows_full * LANES:].astype(jnp.float32),
                      y_flat[rows_full * LANES:].astype(jnp.float32)))

    loss = (main_sum + tail_sum) / jnp.float32(total)
    return loss, zero


def _reference_bce(logits, labels):
    x = logits.astype(jnp.float32)
    y = labels.astype(jnp.float32)
    return jnp.mean(jnp.maximum(x, 0.0) - x * y + jnp.log1p(jnp.exp(-jnp.abs(x))))


if __name__ == "__main__":
    key = jax.random.PRNGKey(0)
    k1, k2, k3, k4, k5, k6 = jax.random.split(key, 6)

    # 1) Small NCHW shapes consistent with a segmentation-style logits/labels pair.
    B, C, H, W = 2, 4, 16, 16  # 2*4*16*16 = 2048 elements (lane aligned, zero-copy path)
    logits = jax.random.normal(k1, (B, C, H, W), dtype=jnp.float32)
    labels = jax.random.bernoulli(k2, p=0.5, shape=(B, C, H, W)).astype(jnp.float32)

    loss, zero = full_loss(logits, labels)
    loss = jax.block_until_ready(loss)
    zero = jax.block_until_ready(zero)

    ref = _reference_bce(logits, labels)
    assert jnp.allclose(loss, ref, atol=1e-5, rtol=1e-5), (float(loss), float(ref))
    assert int(zero[0]) == 0

    # 2) Non-lane-aligned shape: exercises the aligned-prefix + ragged-tail wrapper path.
    lg2 = jax.random.normal(k3, (2, 3, 17, 13), dtype=jnp.float32)
    lb2 = jax.random.bernoulli(k4, p=0.5, shape=(2, 3, 17, 13)).astype(jnp.float32)
    loss2, _ = full_loss(lg2, lb2)
    loss2 = jax.block_until_ready(loss2)
    ref2 = _reference_bce(lg2, lb2)
    assert jnp.allclose(loss2, ref2, atol=1e-5, rtol=1e-5), (float(loss2), float(ref2))

    # 3) Larger lane-aligned bf16 input: multi-tile grid + fori_loop chunk path,
    #    in-kernel bf16 -> f32 cast.
    lg3 = jax.random.normal(k5, (4, 16, 64, 128), dtype=jnp.bfloat16)
    lb3 = jax.random.bernoulli(k6, p=0.5, shape=(4, 16, 64, 128)).astype(jnp.bfloat16)
    loss3, _ = full_loss(lg3, lb3)
    loss3 = jax.block_until_ready(loss3)
    ref3 = _reference_bce(lg3, lb3)
    assert jnp.allclose(loss3, ref3, atol=1e-4, rtol=1e-4), (float(loss3), float(ref3))

    print("KERNEL_OK")
</pallas_src>

<mosaic_0001>
module attributes {stable_mosaic.version = 11 : i64} {
  func.func @kernel(%arg0: i32, %arg1: i32, %arg2: memref<16x128xf32, #tpu.memory_space<vmem>>, %arg3: memref<16x128xf32, #tpu.memory_space<vmem>>, %arg4: memref<16x128xf32, #tpu.memory_space<vmem>>) attributes {dimension_semantics = [#tpu.dimension_semantics<arbitrary>, #tpu.dimension_semantics<arbitrary>], iteration_bounds = array<i64: 1, 1>, scalar_prefetch = 0 : i64, scratch_operands = 0 : i64, tpu.core_type = #tpu.core_type<tc>, window_params = [{transform_indices = @transform_0, window_bounds = array<i64: 16, 128>}, {transform_indices = @transform_1, window_bounds = array<i64: 16, 128>}, {transform_indices = @transform_2, window_bounds = array<i64: 16, 128>}]} {
    %c0_i32 = arith.constant 0 : i32
    %0 = arith.cmpi eq, %arg1, %c0_i32 : i32
    %1 = arith.extui %0 : i1 to i32
    %c0_i32_0 = arith.constant 0 : i32
    %2 = arith.cmpi ne, %1, %c0_i32_0 : i32
    scf.if %2 {
      %cst_9 = arith.constant 0.000000e+00 : f32
      %18 = vector.broadcast %cst_9 : f32 to vector<16x128xf32>
      %c0_10 = arith.constant 0 : index
      %c0_11 = arith.constant 0 : index
      %19 = vector.load %arg4[%c0_10, %c0_11] : memref<16x128xf32, #tpu.memory_space<vmem>>, vector<16x128xf32>
      tpu.vector_store %arg4[%c0_10, %c0_11], %18 {strides = array<i32>} : memref<16x128xf32, #tpu.memory_space<vmem>>, vector<16x128xf32>,
    } else {
    }
    %c0 = arith.constant 0 : index
    %c0_1 = arith.constant 0 : index
    %3 = vector.load %arg2[%c0, %c0_1] : memref<16x128xf32, #tpu.memory_space<vmem>>, vector<16x128xf32>
    %c0_2 = arith.constant 0 : index
    %c0_3 = arith.constant 0 : index
    %4 = vector.load %arg3[%c0_2, %c0_3] : memref<16x128xf32, #tpu.memory_space<vmem>>, vector<16x128xf32>
    %cst = arith.constant 0.000000e+00 : f32
    %5 = vector.broadcast %cst : f32 to vector<16x128xf32>
    %6 = arith.maximumf %3, %5 : vector<16x128xf32>
    %7 = arith.mulf %3, %4 : vector<16x128xf32>
    %8 = arith.subf %6, %7 : vector<16x128xf32>
    %9 = math.absf %3 : vector<16x128xf32>
    %cst_4 = arith.constant 0.000000e+00 : f32
    %10 = vector.broadcast %cst_4 : f32 to vector<16x128xf32>
    %11 = arith.subf %10, %9 : vector<16x128xf32>
    %12 = math.exp %11 : vector<16x128xf32>
    %13 = math.log1p %12 : vector<16x128xf32>
    %14 = arith.addf %8, %13 : vector<16x128xf32>
    %c0_5 = arith.constant 0 : index
    %c0_6 = arith.constant 0 : index
    %15 = vector.load %arg4[%c0_5, %c0_6] : memref<16x128xf32, #tpu.memory_space<vmem>>, vector<16x128xf32>
    %16 = arith.addf %15, %14 : vector<16x128xf32>
    %c0_7 = arith.constant 0 : index
    %c0_8 = arith.constant 0 : index
    %17 = vector.load %arg4[%c0_7, %c0_8] : memref<16x128xf32, #tpu.memory_space<vmem>>, vector<16x128xf32>
    tpu.vector_store %arg4[%c0_7, %c0_8], %16 {strides = array<i32>} : memref<16x128xf32, #tpu.memory_space<vmem>>, vector<16x128xf32>,
    return
  }
  func.func @transform_0(%arg0: i32, %arg1: i32) -> (i32, i32) {
    %c1_i32 = arith.constant 1 : i32
    %0 = arith.muli %arg0, %c1_i32 : i32
    %1 = arith.addi %0, %arg1 : i32
    %c0_i32 = arith.constant 0 : i32
    %c0_i32_0 = arith.constant 0 : i32
    return %1, %c0_i32 : i32, i32
  }
  func.func @transform_1(%arg0: i32, %arg1: i32) -> (i32, i32) {
    %c1_i32 = arith.constant 1 : i32
    %0 = arith.muli %arg0, %c1_i32 : i32
    %1 = arith.addi %0, %arg1 : i32
    %c0_i32 = arith.constant 0 : i32
    %c0_i32_0 = arith.constant 0 : i32
    return %1, %c0_i32 : i32, i32
  }
  func.func @transform_2(%arg0: i32, %arg1: i32) -> (i32, i32) {
    %c0_i32 = arith.constant 0 : i32
    %c0_i32_0 = arith.constant 0 : i32
    return %arg0, %c0_i32 : i32, i32
  }
}

</mosaic_0001>

<bundles_post_ra>
// kernel: tpu_custom_call.1
= control target key start
LH: loop header
LB: loop body
LE: loop exit
PB: predicated region body
PF: predicated region fallthrough
CT: control target
= control target key end

     0   :  { %7 = vsyncpa [#allocation3], 0  ;;  %s238_s0 = inlined_call_operand.hbm [shape: f32[16,128], index: 0, kind: input, shape index: {}]   ;;  %s239_s1 = inlined_call_operand.hbm [shape: f32[16,128], index: 1, kind: input, shape index: {}]   ;;  %s240_s2 = inlined_call_operand.hbm [shape: f32[16,128], index: 2, kind: output, shape index: {}]  }
   0x1   :  { %8 = vsyncpa [#allocation6], 0 }
   0x2   :  { %9 = vsyncpa [#allocation4], 0  ;;  %s200_s9 = smov [#allocation2]  }
   0x3   :  { %s19_s10 = sshll.u32 %s200_s9, 4  ;;  %s20_s10 = int_to_ptr.vmem [resolvable:$true] %s19_s10 }
   0x4   :  { %s142_s11 = scalar_lea.vmem %s20_s10, 256  ;;  %p147_p1 = scmp.lt.s32.totalorder %s20_s10, %s20_s10 }
   0x5   :  { %p143_p0 = scmp.ne.s32.totalorder %s20_s10, %s142_s11  ;;  %p148_p2 = scmp.lt.s32.totalorder %s142_s11, %s142_s11 }
   0x7   :  { %p149_p3 = por %p148_p2, %p147_p1 }
   0x9   :  { %p150_p4 = pnand %p149_p3, %p143_p0 }
   0xb   :  { %153 = shalt.err (!%p150_p4)
}
   0xc   :  { %s201_s12 = smov 128   ;;  %s202_s13 = smov 8  }
   0xd   :  { %25 = dma.hbm_to_vmem [thread:$0]  %s238_s0, 256, %s20_s10, [#allocation3], %s201_s12, %s201_s12, %s202_s13  }
   0xe   :  { %s203_s16 = smov [#allocation5]  }
   0xf   :  { %s35_s17 = sshll.u32 %s203_s16, 4  ;;  %s36_s17 = int_to_ptr.vmem [resolvable:$true] %s35_s17 }
  0x10   :  { %s162_s18 = scalar_lea.vmem %s36_s17, 256  ;;  %p167_p6 = scmp.lt.s32.totalorder %s36_s17, %s36_s17 }
  0x11   :  { %p163_p5 = scmp.ne.s32.totalorder %s36_s17, %s162_s18  ;;  %p168_p7 = scmp.lt.s32.totalorder %s162_s18, %s162_s18 }
  0x13   :  { %p169_p8 = por %p168_p7, %p167_p6 }
  0x15   :  { %p170_p9 = pnand %p169_p8, %p163_p5 }
  0x17   :  { %173 = shalt.err (!%p170_p9)
}
  0x18   :  { %41 = dma.hbm_to_vmem [thread:$0]  %s239_s1, 256, %s36_s17, [#allocation6], %s201_s12, %s201_s12, %s202_s13  }
  0x19   :  { %194 = dma.done.wait [#allocation3], 256  }
  0x1a   :  { %195 = vsyncadd [#allocation3], 4294967040 }
  0x1b   :  { %196 = dma.done.wait [#allocation6], 256  }
  0x1c   :  { %197 = vsyncadd [#allocation6], 4294967040  ;;  %v58_v0 = vld [vmem:[#allocation2] sm:$0xff]  ;;  %v59_v1 = vld [vmem:[#allocation2 + $0x8] sm:$0xff]  ;;  %s204_s0 = smov [#allocation7]  }
  0x1d   :  { %v68_v2 = vand.u32 2147483647, %v58_v0  ;;  %v69_v3 = vand.u32 2147483647, %v59_v1  ;;  %v60_v14 = vld [vmem:[#allocation5] sm:$0xff]  ;;  %v61_v15 = vld [vmem:[#allocation5 + $0x8] sm:$0xff] }
  0x1e   :  { %v62_v17 = vmax.f32 %v58_v0, 0.0  ;;  %v64_v18 = vmul.f32 %v60_v14, %v58_v0  ;;  %v63_v21 = vmax.f32 %v59_v1, 0.0  ;;  %v65_v22 = vmul.f32 %v61_v15, %v59_v1  ;;  %s107_s1 = sshll.u32 %s204_s0, 4  ;;  %s108_s1 = int_to_ptr.vmem [resolvable:$true] %s107_s1 }
  0x1f   :  { %v70_v4 = vsub.f32 0.0, %v68_v2  ;;  %v71_v5 = vsub.f32 0.0, %v69_v3  ;;  %s174_s21 = scalar_lea.vmem %s108_s1, 256  ;;  %p179_p11 = scmp.lt.s32.totalorder %s108_s1, %s108_s1 }
  0x20   :  { %v66_v26 = vsub.f32 %v62_v17, %v64_v18  ;;  %v67_v30 = vsub.f32 %v63_v21, %v65_v22  ;;  %p175_p10 = scmp.ne.s32.totalorder %s108_s1, %s174_s21  ;;  %p180_p12 = scmp.lt.s32.totalorder %s174_s21, %s174_s21 }
  0x21   :  { %v72_v6 = vmul.f32 1.442695, %v70_v4  ;;  %v74_v7 = vmul.f32 1.442695, %v71_v5 }
  0x22   :  { %p181_p13 = por %p180_p12, %p179_p11 }
  0x23   :  { %126 = vpow2.f32 %v72_v6 }
  0x24   :  { %128 = vpow2.f32 %v74_v7  ;;  %p182_p0 = pnand %p181_p13, %p175_p10 }
  0x30   :  { %v127_v8 = vpop.eup %126 }
  0x31   :  { %v129_v9 = vpop.eup %128  ;;  %v76_v10 = vadd.f32 1.0, %v127_v8  ;;  %v79_v12 = vmul.f32 -0.5, %v127_v8  ;;  %v82_v19 = vand.u32 2147483647, %v127_v8 }
  0x32   :  { %v85_v11 = vadd.f32 1.0, %v129_v9  ;;  %v88_v13 = vmul.f32 -0.5, %v129_v9  ;;  %v91_v23 = vand.u32 2147483647, %v129_v9 }
  0x33   :  { %130 = vlog2.f32 %v76_v10  ;;  %v80_v16 = vadd.f32 1.0, %v79_v12  ;;  %vm83_vm0 = vcmp.lt.f32.partialorder %v82_v19, 0.0004427343 }
  0x34   :  { %132 = vlog2.f32 %v85_v11  ;;  %v89_v20 = vadd.f32 1.0, %v88_v13  ;;  %vm92_vm1 = vcmp.lt.f32.partialorder %v91_v23, 0.0004427343 }
  0x35   :  { %v81_v24 = vmul.f32 %v127_v8, %v80_v16 }
  0x36   :  { %v90_v27 = vmul.f32 %v129_v9, %v89_v20 }
  0x40   :  { %v131_v25 = vpop.eup %130 }
  0x41   :  { %v133_v28 = vpop.eup %132  ;;  %v78_v29 = vmul.f32 0.6931472, %v131_v25 }
  0x42   :  { %v87_v31 = vmul.f32 0.6931472, %v133_v28 }
  0x43   :  { %v84_v32 = vsel %vm83_vm0, %v81_v24, %v78_v29 }
  0x44   :  { %v94_v33 = vadd.f32 %v84_v32, %v66_v26  ;;  %v93_v34 = vsel %vm92_vm1, %v90_v27, %v87_v31 }
  0x45   :  { %v95_v35 = vadd.f32 %v93_v34, %v67_v30 }
  0x46   :  { %100 = vst [vmem:[#allocation7] sm:$0xff] %v94_v33 }
  0x47   :  { %101 = vst [vmem:[#allocation7 + $0x8] sm:$0xff] %v95_v35 }
  0x48   :  { %185 = shalt.err (!%p182_p0)
}
  0x49   :  { %113 = dma.vmem_to_hbm [thread:$0]  %s108_s1, 256, %s240_s2, [#allocation4], %s201_s12, %s201_s12, %s202_s13  }
  0x4a   :  { %198 = dma.done.wait [#allocation4], 256  }
  0x4b   :  { %199 = vsyncadd [#allocation4], 4294967040 }
  0x4c   :  { %117 = vsyncpa [#allocation3], 1 }
  0x4d   :  { %118 = vsyncpa [#allocation6], 1 }
  0x4e   :  { %119 = vsyncpa [#allocation4], 1 }

</bundles_post_ra>
